<compile_context>
chip_gen: v7x
topology: tpu7x:2x2x1
jax: 0.10.0
libtpu: 0.0.40
codegen_flags: <defaults>
</compile_context>

<pallas_src>
import jax
import jax.numpy as jnp
import numpy as np
from jax.experimental import pallas as pl
from jax.experimental.pallas import tpu as pltpu

# ---------------- model hyper-parameters (from the pickle / config) ----------
RANK = 32              # config.rank
ORDER = 3              # fixed in __init__
BS = 2                 # batch size (number of flows / graphs)
FLOW_LEN = 8           # max_flow_length (from the dataset info pickle)
N_NODES = BS * FLOW_LEN
NUM_CLASSES = 8        # num_classes (from the dataset info pickle)
NUM_STAT_FEATS = 39    # feature_tf input size (config.stat == True)
BN_EPS = 1e-5
GIN_EPS = 0.0          # dgl GINConv: init_eps=0, learn_eps=False

# row offsets inside the coalesced slabs
MISC_WSEQ = 2 * N_NODES                       # w_seq row in the misc slab
MISC_BSEQ = 2 * N_NODES + 1                   # b_seq row in the misc slab
TAIL_FTF = ORDER * RANK                       # first row of folded feature_tf
TAIL_BIAS = ORDER * RANK + NUM_STAT_FEATS     # combined-bias row


# ---------------- the single fused kernel ------------------------------------
def graphiot_kernel(feats_ref, flow_ref, gin_w_ref, gin_aff_ref,
                    tail_ref, misc_ref, y_ref):
    f32 = jnp.float32

    # host-precomputed chain-neighbour masks + seq_encoder params (one slab)
    mask_prev = misc_ref[pl.ds(0, N_NODES), :]            # (N, R)
    mask_next = misc_ref[pl.ds(N_NODES, N_NODES), :]      # (N, R)
    w_seq = misc_ref[pl.ds(MISC_WSEQ, 1), :]              # (1, R)
    b_seq = misc_ref[pl.ds(MISC_BSEQ, 1), :]              # (1, R)

    # ---- seq_encoder: Linear(1, rank) == outer-product broadcast -------------
    h = feats_ref[...] * w_seq + b_seq                     # (N, R)

    # ---- feature_tf -> classifier (host-folded) + combined bias --------------
    logits = jnp.dot(flow_ref[...],
                     tail_ref[pl.ds(TAIL_FTF, NUM_STAT_FEATS), :],
                     preferred_element_type=f32) \
             + tail_ref[pl.ds(TAIL_BIAS, 1), :]            # (BS, C)

    for layer in range(ORDER):
        # GINConv 'sum' aggregation on the bidirectional per-flow chain:
        #   agg[i] = h[i-1] + h[i+1]   (flow boundaries masked; XLU rolls)
        h_prev = pltpu.roll(h, shift=1, axis=0)             # h_prev[i] = h[i-1]
        h_next = pltpu.roll(h, shift=N_NODES - 1, axis=0)   # h_next[i] = h[i+1]
        if GIN_EPS != 0.0:  # trace-time guard: eps == 0 -> skip the multiply
            x = (1.0 + GIN_EPS) * h + mask_prev * h_prev + mask_next * h_next
        else:
            x = h + mask_prev * h_prev + mask_next * h_next

        # MLP: 3 x [Linear -> Dropout(identity, eval) -> ReLU -> BatchNorm1d(eval)]
        # BN folded on host into a per-channel scale/shift FMA.
        for blk in range(3):
            idx = layer * 3 + blk
            x = jnp.dot(x, gin_w_ref[idx], preferred_element_type=f32) \
                + gin_aff_ref[pl.ds(idx, 1), :]
            x = jnp.maximum(x, 0.0)                                     # ReLU
            x = x * gin_aff_ref[pl.ds(9 + idx, 1), :] \
                + gin_aff_ref[pl.ds(18 + idx, 1), :]
        h = x

        # per-flow readout = sublane segment-sum (no seg matmul), immediately
        # projected through this layer's folded (R, C) weight into the logits.
        readout = jnp.sum(x.reshape(BS, FLOW_LEN, RANK), axis=1)        # (BS, R)
        logits = logits + jnp.dot(readout,
                                  tail_ref[pl.ds(layer * RANK, RANK), :],
                                  preferred_element_type=f32)

    y_ref[...] = logits


# ---------------- forward wrapper ---------------------------------------------
@jax.jit
def graphiot_forward(flow_feature, node_feats, packed):
    feats = node_feats.reshape(-1, 1).astype(jnp.float32)               # (N, 1)
    inputs = (feats, flow_feature,
              packed["gin_w"], packed["gin_aff"], packed["tail"], packed["misc"])
    return pl.pallas_call(
        graphiot_kernel,
        out_shape=jax.ShapeDtypeStruct((BS, NUM_CLASSES), jnp.float32),
        in_specs=[pl.BlockSpec(memory_space=pltpu.MemorySpace.VMEM)
                  for _ in inputs],
        out_specs=pl.BlockSpec(memory_space=pltpu.MemorySpace.VMEM),
    )(*inputs)


# ---------------- host-side parameter packing / algebraic folding --------------
def pack_params(params):
    """Fold eval-BN + the whole linear tail, coalesce everything into 4 slabs."""
    gin_w, gin_b, gin_scale, gin_shift = [], [], [], []
    for p in params["gin"]:
        gin_w.append(p["w"])                                            # (3, R, R)
        gin_b.append(p["b"].reshape(3, RANK))
        scale = p["gamma"].reshape(3, RANK) / jnp.sqrt(
            p["var"].reshape(3, RANK) + BN_EPS)
        gin_scale.append(scale)
        gin_shift.append(p["beta"].reshape(3, RANK)
                         - p["mean"].reshape(3, RANK) * scale)
    gin_w = jnp.concatenate(gin_w, axis=0)                              # (9, R, R)
    gin_aff = jnp.concatenate([jnp.concatenate(gin_b, axis=0),          # rows 0..8
                               jnp.concatenate(gin_scale, axis=0),      # rows 9..17
                               jnp.concatenate(gin_shift, axis=0)],     # rows 18..26
                              axis=0)                                   # (27, R)

    # fold graph_tf/feature_tf/classifier (all linear, no nonlinearity between):
    #   y = all_readout @ (w_gtf @ wc_g) + flow @ (w_ftf @ wc_f)
    #       + (b_gtf @ wc_g + b_ftf @ wc_f + b_cls)
    wc_g = params["w_cls"][:RANK]                                       # (R, C)
    wc_f = params["w_cls"][RANK:]                                       # (R, C)
    w_ro_fold = params["w_gtf"] @ wc_g                                  # (3R, C)
    w_ftf_fold = params["w_ftf"] @ wc_f                                 # (39, C)
    bias_fold = (params["b_gtf"] @ wc_g + params["b_ftf"] @ wc_f
                 + params["b_cls"])                                     # (1, C)
    tail = jnp.concatenate([w_ro_fold, w_ftf_fold, bias_fold], axis=0)  # (136, C)

    # chain-graph neighbour masks (host-precomputed) + seq_encoder params
    pos = np.arange(N_NODES) % FLOW_LEN
    mask_prev = np.broadcast_to((pos != 0).astype(np.float32)[:, None],
                                (N_NODES, RANK))
    mask_next = np.broadcast_to((pos != FLOW_LEN - 1).astype(np.float32)[:, None],
                                (N_NODES, RANK))
    misc = jnp.concatenate([jnp.asarray(mask_prev), jnp.asarray(mask_next),
                            params["w_seq"], params["b_seq"]], axis=0)  # (34, R)

    return {"gin_w": gin_w, "gin_aff": gin_aff, "tail": tail, "misc": misc}


# ---------------- plain-JAX reference (ground-truth semantics) -----------------
def reference_forward(flow_feature, node_feats, adj, params):
    h = node_feats.reshape(-1, 1) * params["w_seq"] + params["b_seq"]
    readouts = []
    for i in range(ORDER):
        p = params["gin"][i]
        x = (1.0 + GIN_EPS) * h + adj @ h
        for blk in range(3):
            x = x @ p["w"][blk] + p["b"][blk]
            x = jnp.maximum(x, 0.0)
            x = (x - p["mean"][blk]) * (p["gamma"][blk] /
                                        jnp.sqrt(p["var"][blk] + BN_EPS)) + p["beta"][blk]
        h = x
        readouts.append(x.reshape(BS, FLOW_LEN, RANK).sum(axis=1))
    all_r = jnp.concatenate(readouts, axis=-1)
    g = all_r @ params["w_gtf"] + params["b_gtf"]
    f = flow_feature @ params["w_ftf"] + params["b_ftf"]
    return jnp.concatenate([g, f], axis=-1) @ params["w_cls"] + params["b_cls"]


# ---------------- deterministic parameter init ---------------------------------
def init_params(key):
    ks = jax.random.split(key, 16)
    scale = 0.15
    params = {
        "w_seq": jax.random.normal(ks[0], (1, RANK), jnp.float32) * 0.5,
        "b_seq": jax.random.normal(ks[1], (1, RANK), jnp.float32) * 0.1,
        "gin": [],
        "w_gtf": jax.random.normal(ks[2], (RANK * ORDER, RANK), jnp.float32) * scale,
        "b_gtf": jax.random.normal(ks[3], (1, RANK), jnp.float32) * 0.1,
        "w_ftf": jax.random.normal(ks[4], (NUM_STAT_FEATS, RANK), jnp.float32) * scale,
        "b_ftf": jax.random.normal(ks[5], (1, RANK), jnp.float32) * 0.1,
        "w_cls": jax.random.normal(ks[6], (RANK * 2, NUM_CLASSES), jnp.float32) * scale,
        "b_cls": jax.random.normal(ks[7], (1, NUM_CLASSES), jnp.float32) * 0.1,
    }
    for i in range(ORDER):
        kk = jax.random.split(ks[8 + i], 6)
        params["gin"].append({
            "w": jax.random.normal(kk[0], (3, RANK, RANK), jnp.float32) * scale,
            "b": jax.random.normal(kk[1], (3, 1, RANK), jnp.float32) * 0.1,
            "gamma": 1.0 + 0.1 * jax.random.normal(kk[2], (3, 1, RANK), jnp.float32),
            "beta": 0.1 * jax.random.normal(kk[3], (3, 1, RANK), jnp.float32),
            "mean": 0.1 * jax.random.normal(kk[4], (3, 1, RANK), jnp.float32),
            "var": 1.0 + 0.1 * jax.random.uniform(kk[5], (3, 1, RANK), jnp.float32),
        })
    return params


# ---------------- main ----------------------------------------------------------
if __name__ == "__main__":
    key = jax.random.PRNGKey(0)
    k_feat, k_flow, k_param = jax.random.split(key, 3)

    # graph node features (graph.ndata['feats']) and statistical flow features
    node_feats = jax.random.normal(k_feat, (N_NODES,), jnp.float32)
    flow_feature = jax.random.normal(k_flow, (BS, NUM_STAT_FEATS), jnp.float32)

    # dense adjacency (bidirectional chain per flow) -- used ONLY by the
    # plain-JAX reference; the kernel exploits the chain structure via rolls.
    A = np.zeros((N_NODES, N_NODES), np.float32)
    for b in range(BS):
        base = b * FLOW_LEN
        for t in range(FLOW_LEN - 1):
            A[base + t + 1, base + t] = 1.0   # src -> dst
            A[base + t, base + t + 1] = 1.0   # dst -> src
    adj = jnp.asarray(A)

    params = init_params(k_param)
    packed = pack_params(params)

    y = graphiot_forward(flow_feature, node_feats, packed)
    y = jax.block_until_ready(y)

    y_ref = reference_forward(flow_feature, node_feats, adj, params)
    np.testing.assert_allclose(np.asarray(y), np.asarray(y_ref), rtol=1e-2, atol=1e-2)
    assert y.shape == (BS, NUM_CLASSES)

    print("KERNEL_OK")
</pallas_src>

<mosaic_0001>
module attributes {stable_mosaic.version = 11 : i64} {
  func.func @graphiot_kernel(%arg0: memref<16x1xf32, #tpu.memory_space<vmem>>, %arg1: memref<2x39xf32, #tpu.memory_space<vmem>>, %arg2: memref<9x32x32xf32, #tpu.memory_space<vmem>>, %arg3: memref<27x32xf32, #tpu.memory_space<vmem>>, %arg4: memref<136x8xf32, #tpu.memory_space<vmem>>, %arg5: memref<34x32xf32, #tpu.memory_space<vmem>>, %arg6: memref<2x8xf32, #tpu.memory_space<vmem>>) attributes {dimension_semantics = [], scalar_prefetch = 0 : i64, scratch_operands = 0 : i64, tpu.core_type = #tpu.core_type<tc>} {
    %c0 = arith.constant 0 : index
    %c0_0 = arith.constant 0 : index
    %0 = vector.load %arg5[%c0, %c0_0] : memref<34x32xf32, #tpu.memory_space<vmem>>, vector<16x32xf32>
    %c16 = arith.constant 16 : index
    %c0_1 = arith.constant 0 : index
    %1 = vector.load %arg5[%c16, %c0_1] : memref<34x32xf32, #tpu.memory_space<vmem>>, vector<16x32xf32>
    %c32 = arith.constant 32 : index
    %c0_2 = arith.constant 0 : index
    %2 = vector.load %arg5[%c32, %c0_2] : memref<34x32xf32, #tpu.memory_space<vmem>>, vector<1x32xf32>
    %c33 = arith.constant 33 : index
    %c0_3 = arith.constant 0 : index
    %3 = vector.load %arg5[%c33, %c0_3] : memref<34x32xf32, #tpu.memory_space<vmem>>, vector<1x32xf32>
    %c0_4 = arith.constant 0 : index
    %c0_5 = arith.constant 0 : index
    %4 = vector.load %arg0[%c0_4, %c0_5] : memref<16x1xf32, #tpu.memory_space<vmem>>, vector<16x1xf32>
    %5 = vector.broadcast %4 : vector<16x1xf32> to vector<16x32xf32>
    %6 = vector.broadcast %2 : vector<1x32xf32> to vector<16x32xf32>
    %7 = arith.mulf %5, %6 : vector<16x32xf32>
    %8 = vector.broadcast %3 : vector<1x32xf32> to vector<16x32xf32>
    %9 = arith.addf %7, %8 : vector<16x32xf32>
    %c0_6 = arith.constant 0 : index
    %c0_7 = arith.constant 0 : index
    %10 = vector.load %arg1[%c0_6, %c0_7] : memref<2x39xf32, #tpu.memory_space<vmem>>, vector<2x39xf32>
    %c96 = arith.constant 96 : index
    %c0_8 = arith.constant 0 : index
    %11 = vector.load %arg4[%c96, %c0_8] : memref<136x8xf32, #tpu.memory_space<vmem>>, vector<39x8xf32>
    %cst = arith.constant dense<0.000000e+00> : vector<2x8xf32>
    %12 = tpu.matmul %10, %11, %cst {dimension_numbers = #tpu.dot_dimension_numbers<[1], [0], [0], [1], [0, 0, 1, 1], [], []>} : vector<2x39xf32>, vector<39x8xf32>, vector<2x8xf32> -> vector<2x8xf32>
    %c135 = arith.constant 135 : index
    %c0_9 = arith.constant 0 : index
    %13 = vector.load %arg4[%c135, %c0_9] : memref<136x8xf32, #tpu.memory_space<vmem>>, vector<1x8xf32>
    %14 = vector.broadcast %13 : vector<1x8xf32> to vector<2x8xf32>
    %15 = arith.addf %12, %14 : vector<2x8xf32>
    %c1_i32 = arith.constant 1 : i32
    %16 = tpu.dynamic_rotate %9 by %c1_i32 dim 0 : vector<16x32xf32>, i32 -> vector<16x32xf32>
    %c15_i32 = arith.constant 15 : i32
    %17 = tpu.dynamic_rotate %9 by %c15_i32 dim 0 : vector<16x32xf32>, i32 -> vector<16x32xf32>
    %18 = arith.mulf %0, %16 : vector<16x32xf32>
    %19 = arith.addf %9, %18 : vector<16x32xf32>
    %20 = arith.mulf %1, %17 : vector<16x32xf32>
    %21 = arith.addf %19, %20 : vector<16x32xf32>
    %c0_10 = arith.constant 0 : index
    %c0_11 = arith.constant 0 : index
    %c0_12 = arith.constant 0 : index
    %22 = vector.load %arg2[%c0_10, %c0_11, %c0_12] : memref<9x32x32xf32, #tpu.memory_space<vmem>>, vector<1x32x32xf32>
    %23 = vector.shape_cast %22 : vector<1x32x32xf32> to vector<32x32xf32>
    %cst_13 = arith.constant dense<0.000000e+00> : vector<16x32xf32>
    %24 = tpu.matmul %21, %23, %cst_13 {dimension_numbers = #tpu.dot_dimension_numbers<[1], [0], [0], [1], [0, 0, 1, 1], [], []>} : vector<16x32xf32>, vector<32x32xf32>, vector<16x32xf32> -> vector<16x32xf32>
    %c0_14 = arith.constant 0 : index
    %c0_15 = arith.constant 0 : index
    %25 = vector.load %arg3[%c0_14, %c0_15] : memref<27x32xf32, #tpu.memory_space<vmem>>, vector<1x32xf32>
    %26 = vector.broadcast %25 : vector<1x32xf32> to vector<16x32xf32>
    %27 = arith.addf %24, %26 : vector<16x32xf32>
    %cst_16 = arith.constant 0.000000e+00 : f32
    %28 = vector.broadcast %cst_16 : f32 to vector<16x32xf32>
    %29 = arith.maximumf %27, %28 : vector<16x32xf32>
    %c9 = arith.constant 9 : index
    %c0_17 = arith.constant 0 : index
    %30 = vector.load %arg3[%c9, %c0_17] : memref<27x32xf32, #tpu.memory_space<vmem>>, vector<1x32xf32>
    %31 = vector.broadcast %30 : vector<1x32xf32> to vector<16x32xf32>
    %32 = arith.mulf %29, %31 : vector<16x32xf32>
    %c18 = arith.constant 18 : index
    %c0_18 = arith.constant 0 : index
    %33 = vector.load %arg3[%c18, %c0_18] : memref<27x32xf32, #tpu.memory_space<vmem>>, vector<1x32xf32>
    %34 = vector.broadcast %33 : vector<1x32xf32> to vector<16x32xf32>
    %35 = arith.addf %32, %34 : vector<16x32xf32>
    %c1 = arith.constant 1 : index
    %c0_19 = arith.constant 0 : index
    %c0_20 = arith.constant 0 : index
    %36 = vector.load %arg2[%c1, %c0_19, %c0_20] : memref<9x32x32xf32, #tpu.memory_space<vmem>>, vector<1x32x32xf32>
    %37 = vector.shape_cast %36 : vector<1x32x32xf32> to vector<32x32xf32>
    %cst_21 = arith.constant dense<0.000000e+00> : vector<16x32xf32>
    %38 = tpu.matmul %35, %37, %cst_21 {dimension_numbers = #tpu.dot_dimension_numbers<[1], [0], [0], [1], [0, 0, 1, 1], [], []>} : vector<16x32xf32>, vector<32x32xf32>, vector<16x32xf32> -> vector<16x32xf32>
    %c1_22 = arith.constant 1 : index
    %c0_23 = arith.constant 0 : index
    %39 = vector.load %arg3[%c1_22, %c0_23] : memref<27x32xf32, #tpu.memory_space<vmem>>, vector<1x32xf32>
    %40 = vector.broadcast %39 : vector<1x32xf32> to vector<16x32xf32>
    %41 = arith.addf %38, %40 : vector<16x32xf32>
    %cst_24 = arith.constant 0.000000e+00 : f32
    %42 = vector.broadcast %cst_24 : f32 to vector<16x32xf32>
    %43 = arith.maximumf %41, %42 : vector<16x32xf32>
    %c10 = arith.constant 10 : index
    %c0_25 = arith.constant 0 : index
    %44 = vector.load %arg3[%c10, %c0_25] : memref<27x32xf32, #tpu.memory_space<vmem>>, vector<1x32xf32>
    %45 = vector.broadcast %44 : vector<1x32xf32> to vector<16x32xf32>
    %46 = arith.mulf %43, %45 : vector<16x32xf32>
    %c19 = arith.constant 19 : index
    %c0_26 = arith.constant 0 : index
    %47 = vector.load %arg3[%c19, %c0_26] : memref<27x32xf32, #tpu.memory_space<vmem>>, vector<1x32xf32>
    %48 = vector.broadcast %47 : vector<1x32xf32> to vector<16x32xf32>
    %49 = arith.addf %46, %48 : vector<16x32xf32>
    %c2 = arith.constant 2 : index
    %c0_27 = arith.constant 0 : index
    %c0_28 = arith.constant 0 : index
    %50 = vector.load %arg2[%c2, %c0_27, %c0_28] : memref<9x32x32xf32, #tpu.memory_space<vmem>>, vector<1x32x32xf32>
    %51 = vector.shape_cast %50 : vector<1x32x32xf32> to vector<32x32xf32>
    %cst_29 = arith.constant dense<0.000000e+00> : vector<16x32xf32>
    %52 = tpu.matmul %49, %51, %cst_29 {dimension_numbers = #tpu.dot_dimension_numbers<[1], [0], [0], [1], [0, 0, 1, 1], [], []>} : vector<16x32xf32>, vector<32x32xf32>, vector<16x32xf32> -> vector<16x32xf32>
    %c2_30 = arith.constant 2 : index
    %c0_31 = arith.constant 0 : index
    %53 = vector.load %arg3[%c2_30, %c0_31] : memref<27x32xf32, #tpu.memory_space<vmem>>, vector<1x32xf32>
    %54 = vector.broadcast %53 : vector<1x32xf32> to vector<16x32xf32>
    %55 = arith.addf %52, %54 : vector<16x32xf32>
    %cst_32 = arith.constant 0.000000e+00 : f32
    %56 = vector.broadcast %cst_32 : f32 to vector<16x32xf32>
    %57 = arith.maximumf %55, %56 : vector<16x32xf32>
    %c11 = arith.constant 11 : index
    %c0_33 = arith.constant 0 : index
    %58 = vector.load %arg3[%c11, %c0_33] : memref<27x32xf32, #tpu.memory_space<vmem>>, vector<1x32xf32>
    %59 = vector.broadcast %58 : vector<1x32xf32> to vector<16x32xf32>
    %60 = arith.mulf %57, %59 : vector<16x32xf32>
    %c20 = arith.constant 20 : index
    %c0_34 = arith.constant 0 : index
    %61 = vector.load %arg3[%c20, %c0_34] : memref<27x32xf32, #tpu.memory_space<vmem>>, vector<1x32xf32>
    %62 = vector.broadcast %61 : vector<1x32xf32> to vector<16x32xf32>
    %63 = arith.addf %60, %62 : vector<16x32xf32>
    %64 = vector.shape_cast %63 : vector<16x32xf32> to vector<2x8x32xf32>
    %cst_35 = arith.constant dense<0.000000e+00> : vector<2x32xf32>
    %65 = vector.multi_reduction <add>, %64, %cst_35 [1] : vector<2x8x32xf32> to vector<2x32xf32>
    %c0_36 = arith.constant 0 : index
    %c0_37 = arith.constant 0 : index
    %66 = vector.load %arg4[%c0_36, %c0_37] : memref<136x8xf32, #tpu.memory_space<vmem>>, vector<32x8xf32>
    %cst_38 = arith.constant dense<0.000000e+00> : vector<2x8xf32>
    %67 = tpu.matmul %65, %66, %cst_38 {dimension_numbers = #tpu.dot_dimension_numbers<[1], [0], [0], [1], [0, 0, 1, 1], [], []>} : vector<2x32xf32>, vector<32x8xf32>, vector<2x8xf32> -> vector<2x8xf32>
    %68 = arith.addf %15, %67 : vector<2x8xf32>
    %c1_i32_39 = arith.constant 1 : i32
    %69 = tpu.dynamic_rotate %63 by %c1_i32_39 dim 0 : vector<16x32xf32>, i32 -> vector<16x32xf32>
    %c15_i32_40 = arith.constant 15 : i32
    %70 = tpu.dynamic_rotate %63 by %c15_i32_40 dim 0 : vector<16x32xf32>, i32 -> vector<16x32xf32>
    %71 = arith.mulf %0, %69 : vector<16x32xf32>
    %72 = arith.addf %63, %71 : vector<16x32xf32>
    %73 = arith.mulf %1, %70 : vector<16x32xf32>
    %74 = arith.addf %72, %73 : vector<16x32xf32>
    %c3 = arith.constant 3 : index
    %c0_41 = arith.constant 0 : index
    %c0_42 = arith.constant 0 : index
    %75 = vector.load %arg2[%c3, %c0_41, %c0_42] : memref<9x32x32xf32, #tpu.memory_space<vmem>>, vector<1x32x32xf32>
    %76 = vector.shape_cast %75 : vector<1x32x32xf32> to vector<32x32xf32>
    %cst_43 = arith.constant dense<0.000000e+00> : vector<16x32xf32>
    %77 = tpu.matmul %74, %76, %cst_43 {dimension_numbers = #tpu.dot_dimension_numbers<[1], [0], [0], [1], [0, 0, 1, 1], [], []>} : vector<16x32xf32>, vector<32x32xf32>, vector<16x32xf32> -> vector<16x32xf32>
    %c3_44 = arith.constant 3 : index
    %c0_45 = arith.constant 0 : index
    %78 = vector.load %arg3[%c3_44, %c0_45] : memref<27x32xf32, #tpu.memory_space<vmem>>, vector<1x32xf32>
    %79 = vector.broadcast %78 : vector<1x32xf32> to vector<16x32xf32>
    %80 = arith.addf %77, %79 : vector<16x32xf32>
    %cst_46 = arith.constant 0.000000e+00 : f32
    %81 = vector.broadcast %cst_46 : f32 to vector<16x32xf32>
    %82 = arith.maximumf %80, %81 : vector<16x32xf32>
    %c12 = arith.constant 12 : index
    %c0_47 = arith.constant 0 : index
    %83 = vector.load %arg3[%c12, %c0_47] : memref<27x32xf32, #tpu.memory_space<vmem>>, vector<1x32xf32>
    %84 = vector.broadcast %83 : vector<1x32xf32> to vector<16x32xf32>
    %85 = arith.mulf %82, %84 : vector<16x32xf32>
    %c21 = arith.constant 21 : index
    %c0_48 = arith.constant 0 : index
    %86 = vector.load %arg3[%c21, %c0_48] : memref<27x32xf32, #tpu.memory_space<vmem>>, vector<1x32xf32>
    %87 = vector.broadcast %86 : vector<1x32xf32> to vector<16x32xf32>
    %88 = arith.addf %85, %87 : vector<16x32xf32>
    %c4 = arith.constant 4 : index
    %c0_49 = arith.constant 0 : index
    %c0_50 = arith.constant 0 : index
    %89 = vector.load %arg2[%c4, %c0_49, %c0_50] : memref<9x32x32xf32, #tpu.memory_space<vmem>>, vector<1x32x32xf32>
    %90 = vector.shape_cast %89 : vector<1x32x32xf32> to vector<32x32xf32>
    %cst_51 = arith.constant dense<0.000000e+00> : vector<16x32xf32>
    %91 = tpu.matmul %88, %90, %cst_51 {dimension_numbers = #tpu.dot_dimension_numbers<[1], [0], [0], [1], [0, 0, 1, 1], [], []>} : vector<16x32xf32>, vector<32x32xf32>, vector<16x32xf32> -> vector<16x32xf32>
    %c4_52 = arith.constant 4 : index
    %c0_53 = arith.constant 0 : index
    %92 = vector.load %arg3[%c4_52, %c0_53] : memref<27x32xf32, #tpu.memory_space<vmem>>, vector<1x32xf32>
    %93 = vector.broadcast %92 : vector<1x32xf32> to vector<16x32xf32>
    %94 = arith.addf %91, %93 : vector<16x32xf32>
    %cst_54 = arith.constant 0.000000e+00 : f32
    %95 = vector.broadcast %cst_54 : f32 to vector<16x32xf32>
    %96 = arith.maximumf %94, %95 : vector<16x32xf32>
    %c13 = arith.constant 13 : index
    %c0_55 = arith.constant 0 : index
    %97 = vector.load %arg3[%c13, %c0_55] : memref<27x32xf32, #tpu.memory_space<vmem>>, vector<1x32xf32>
    %98 = vector.broadcast %97 : vector<1x32xf32> to vector<16x32xf32>
    %99 = arith.mulf %96, %98 : vector<16x32xf32>
    %c22 = arith.constant 22 : index
    %c0_56 = arith.constant 0 : index
    %100 = vector.load %arg3[%c22, %c0_56] : memref<27x32xf32, #tpu.memory_space<vmem>>, vector<1x32xf32>
    %101 = vector.broadcast %100 : vector<1x32xf32> to vector<16x32xf32>
    %102 = arith.addf %99, %101 : vector<16x32xf32>
    %c5 = arith.constant 5 : index
    %c0_57 = arith.constant 0 : index
    %c0_58 = arith.constant 0 : index
    %103 = vector.load %arg2[%c5, %c0_57, %c0_58] : memref<9x32x32xf32, #tpu.memory_space<vmem>>, vector<1x32x32xf32>
    %104 = vector.shape_cast %103 : vector<1x32x32xf32> to vector<32x32xf32>
    %cst_59 = arith.constant dense<0.000000e+00> : vector<16x32xf32>
    %105 = tpu.matmul %102, %104, %cst_59 {dimension_numbers = #tpu.dot_dimension_numbers<[1], [0], [0], [1], [0, 0, 1, 1], [], []>} : vector<16x32xf32>, vector<32x32xf32>, vector<16x32xf32> -> vector<16x32xf32>
    %c5_60 = arith.constant 5 : index
    %c0_61 = arith.constant 0 : index
    %106 = vector.load %arg3[%c5_60, %c0_61] : memref<27x32xf32, #tpu.memory_space<vmem>>, vector<1x32xf32>
    %107 = vector.broadcast %106 : vector<1x32xf32> to vector<16x32xf32>
    %108 = arith.addf %105, %107 : vector<16x32xf32>
    %cst_62 = arith.constant 0.000000e+00 : f32
    %109 = vector.broadcast %cst_62 : f32 to vector<16x32xf32>
    %110 = arith.maximumf %108, %109 : vector<16x32xf32>
    %c14 = arith.constant 14 : index
    %c0_63 = arith.constant 0 : index
    %111 = vector.load %arg3[%c14, %c0_63] : memref<27x32xf32, #tpu.memory_space<vmem>>, vector<1x32xf32>
    %112 = vector.broadcast %111 : vector<1x32xf32> to vector<16x32xf32>
    %113 = arith.mulf %110, %112 : vector<16x32xf32>
    %c23 = arith.constant 23 : index
    %c0_64 = arith.constant 0 : index
    %114 = vector.load %arg3[%c23, %c0_64] : memref<27x32xf32, #tpu.memory_space<vmem>>, vector<1x32xf32>
    %115 = vector.broadcast %114 : vector<1x32xf32> to vector<16x32xf32>
    %116 = arith.addf %113, %115 : vector<16x32xf32>
    %117 = vector.shape_cast %116 : vector<16x32xf32> to vector<2x8x32xf32>
    %cst_65 = arith.constant dense<0.000000e+00> : vector<2x32xf32>
    %118 = vector.multi_reduction <add>, %117, %cst_65 [1] : vector<2x8x32xf32> to vector<2x32xf32>
    %c32_66 = arith.constant 32 : index
    %c0_67 = arith.constant 0 : index
    %119 = vector.load %arg4[%c32_66, %c0_67] : memref<136x8xf32, #tpu.memory_space<vmem>>, vector<32x8xf32>
    %cst_68 = arith.constant dense<0.000000e+00> : vector<2x8xf32>
    %120 = tpu.matmul %118, %119, %cst_68 {dimension_numbers = #tpu.dot_dimension_numbers<[1], [0], [0], [1], [0, 0, 1, 1], [], []>} : vector<2x32xf32>, vector<32x8xf32>, vector<2x8xf32> -> vector<2x8xf32>
    %121 = arith.addf %68, %120 : vector<2x8xf32>
    %c1_i32_69 = arith.constant 1 : i32
    %122 = tpu.dynamic_rotate %116 by %c1_i32_69 dim 0 : vector<16x32xf32>, i32 -> vector<16x32xf32>
    %c15_i32_70 = arith.constant 15 : i32
    %123 = tpu.dynamic_rotate %116 by %c15_i32_70 dim 0 : vector<16x32xf32>, i32 -> vector<16x32xf32>
    %124 = arith.mulf %0, %122 : vector<16x32xf32>
    %125 = arith.addf %116, %124 : vector<16x32xf32>
    %126 = arith.mulf %1, %123 : vector<16x32xf32>
    %127 = arith.addf %125, %126 : vector<16x32xf32>
    %c6 = arith.constant 6 : index
    %c0_71 = arith.constant 0 : index
    %c0_72 = arith.constant 0 : index
    %128 = vector.load %arg2[%c6, %c0_71, %c0_72] : memref<9x32x32xf32, #tpu.memory_space<vmem>>, vector<1x32x32xf32>
    %129 = vector.shape_cast %128 : vector<1x32x32xf32> to vector<32x32xf32>
    %cst_73 = arith.constant dense<0.000000e+00> : vector<16x32xf32>
    %130 = tpu.matmul %127, %129, %cst_73 {dimension_numbers = #tpu.dot_dimension_numbers<[1], [0], [0], [1], [0, 0, 1, 1], [], []>} : vector<16x32xf32>, vector<32x32xf32>, vector<16x32xf32> -> vector<16x32xf32>
    %c6_74 = arith.constant 6 : index
    %c0_75 = arith.constant 0 : index
    %131 = vector.load %arg3[%c6_74, %c0_75] : memref<27x32xf32, #tpu.memory_space<vmem>>, vector<1x32xf32>
    %132 = vector.broadcast %131 : vector<1x32xf32> to vector<16x32xf32>
    %133 = arith.addf %130, %132 : vector<16x32xf32>
    %cst_76 = arith.constant 0.000000e+00 : f32
    %134 = vector.broadcast %cst_76 : f32 to vector<16x32xf32>
    %135 = arith.maximumf %133, %134 : vector<16x32xf32>
    %c15 = arith.constant 15 : index
    %c0_77 = arith.constant 0 : index
    %136 = vector.load %arg3[%c15, %c0_77] : memref<27x32xf32, #tpu.memory_space<vmem>>, vector<1x32xf32>
    %137 = vector.broadcast %136 : vector<1x32xf32> to vector<16x32xf32>
    %138 = arith.mulf %135, %137 : vector<16x32xf32>
    %c24 = arith.constant 24 : index
    %c0_78 = arith.constant 0 : index
    %139 = vector.load %arg3[%c24, %c0_78] : memref<27x32xf32, #tpu.memory_space<vmem>>, vector<1x32xf32>
    %140 = vector.broadcast %139 : vector<1x32xf32> to vector<16x32xf32>
    %141 = arith.addf %138, %140 : vector<16x32xf32>
    %c7 = arith.constant 7 : index
    %c0_79 = arith.constant 0 : index
    %c0_80 = arith.constant 0 : index
    %142 = vector.load %arg2[%c7, %c0_79, %c0_80] : memref<9x32x32xf32, #tpu.memory_space<vmem>>, vector<1x32x32xf32>
    %143 = vector.shape_cast %142 : vector<1x32x32xf32> to vector<32x32xf32>
    %cst_81 = arith.constant dense<0.000000e+00> : vector<16x32xf32>
    %144 = tpu.matmul %141, %143, %cst_81 {dimension_numbers = #tpu.dot_dimension_numbers<[1], [0], [0], [1], [0, 0, 1, 1], [], []>} : vector<16x32xf32>, vector<32x32xf32>, vector<16x32xf32> -> vector<16x32xf32>
    %c7_82 = arith.constant 7 : index
    %c0_83 = arith.constant 0 : index
    %145 = vector.load %arg3[%c7_82, %c0_83] : memref<27x32xf32, #tpu.memory_space<vmem>>, vector<1x32xf32>
    %146 = vector.broadcast %145 : vector<1x32xf32> to vector<16x32xf32>
    %147 = arith.addf %144, %146 : vector<16x32xf32>
    %cst_84 = arith.constant 0.000000e+00 : f32
    %148 = vector.broadcast %cst_84 : f32 to vector<16x32xf32>
    %149 = arith.maximumf %147, %148 : vector<16x32xf32>
    %c16_85 = arith.constant 16 : index
    %c0_86 = arith.constant 0 : index
    %150 = vector.load %arg3[%c16_85, %c0_86] : memref<27x32xf32, #tpu.memory_space<vmem>>, vector<1x32xf32>
    %151 = vector.broadcast %150 : vector<1x32xf32> to vector<16x32xf32>
    %152 = arith.mulf %149, %151 : vector<16x32xf32>
    %c25 = arith.constant 25 : index
    %c0_87 = arith.constant 0 : index
    %153 = vector.load %arg3[%c25, %c0_87] : memref<27x32xf32, #tpu.memory_space<vmem>>, vector<1x32xf32>
    %154 = vector.broadcast %153 : vector<1x32xf32> to vector<16x32xf32>
    %155 = arith.addf %152, %154 : vector<16x32xf32>
    %c8 = arith.constant 8 : index
    %c0_88 = arith.constant 0 : index
    %c0_89 = arith.constant 0 : index
    %156 = vector.load %arg2[%c8, %c0_88, %c0_89] : memref<9x32x32xf32, #tpu.memory_space<vmem>>, vector<1x32x32xf32>
    %157 = vector.shape_cast %156 : vector<1x32x32xf32> to vector<32x32xf32>
    %cst_90 = arith.constant dense<0.000000e+00> : vector<16x32xf32>
    %158 = tpu.matmul %155, %157, %cst_90 {dimension_numbers = #tpu.dot_dimension_numbers<[1], [0], [0], [1], [0, 0, 1, 1], [], []>} : vector<16x32xf32>, vector<32x32xf32>, vector<16x32xf32> -> vector<16x32xf32>
    %c8_91 = arith.constant 8 : index
    %c0_92 = arith.constant 0 : index
    %159 = vector.load %arg3[%c8_91, %c0_92] : memref<27x32xf32, #tpu.memory_space<vmem>>, vector<1x32xf32>
    %160 = vector.broadcast %159 : vector<1x32xf32> to vector<16x32xf32>
    %161 = arith.addf %158, %160 : vector<16x32xf32>
    %cst_93 = arith.constant 0.000000e+00 : f32
    %162 = vector.broadcast %cst_93 : f32 to vector<16x32xf32>
    %163 = arith.maximumf %161, %162 : vector<16x32xf32>
    %c17 = arith.constant 17 : index
    %c0_94 = arith.constant 0 : index
    %164 = vector.load %arg3[%c17, %c0_94] : memref<27x32xf32, #tpu.memory_space<vmem>>, vector<1x32xf32>
    %165 = vector.broadcast %164 : vector<1x32xf32> to vector<16x32xf32>
    %166 = arith.mulf %163, %165 : vector<16x32xf32>
    %c26 = arith.constant 26 : index
    %c0_95 = arith.constant 0 : index
    %167 = vector.load %arg3[%c26, %c0_95] : memref<27x32xf32, #tpu.memory_space<vmem>>, vector<1x32xf32>
    %168 = vector.broadcast %167 : vector<1x32xf32> to vector<16x32xf32>
    %169 = arith.addf %166, %168 : vector<16x32xf32>
    %170 = vector.shape_cast %169 : vector<16x32xf32> to vector<2x8x32xf32>
    %cst_96 = arith.constant dense<0.000000e+00> : vector<2x32xf32>
    %171 = vector.multi_reduction <add>, %170, %cst_96 [1] : vector<2x8x32xf32> to vector<2x32xf32>
    %c64 = arith.constant 64 : index
    %c0_97 = arith.constant 0 : index
    %172 = vector.load %arg4[%c64, %c0_97] : memref<136x8xf32, #tpu.memory_space<vmem>>, vector<32x8xf32>
    %cst_98 = arith.constant dense<0.000000e+00> : vector<2x8xf32>
    %173 = tpu.matmul %171, %172, %cst_98 {dimension_numbers = #tpu.dot_dimension_numbers<[1], [0], [0], [1], [0, 0, 1, 1], [], []>} : vector<2x32xf32>, vector<32x8xf32>, vector<2x8xf32> -> vector<2x8xf32>
    %174 = arith.addf %121, %173 : vector<2x8xf32>
    %c0_99 = arith.constant 0 : index
    %c0_100 = arith.constant 0 : index
    %175 = vector.load %arg6[%c0_99, %c0_100] : memref<2x8xf32, #tpu.memory_space<vmem>>, vector<2x8xf32>
    tpu.vector_store %arg6[%c0_99, %c0_100], %174 {strides = array<i32>} : memref<2x8xf32, #tpu.memory_space<vmem>>, vector<2x8xf32>,
    return
  }
}

</mosaic_0001>

<bundles_post_ra>
// kernel: graphiot_forward.1
= control target key start
LH: loop header
LB: loop body
LE: loop exit
PB: predicated region body
PF: predicated region fallthrough
CT: control target
= control target key end

     0   :  { %11 = vsyncpa [#allocation3], 0  ;;  %s2229_s0 = inlined_call_operand.vmem [shape: f32[16,1], index: 0, kind: input, shape index: {}]   ;;  %s2230_s1 = inlined_call_operand.vmem [shape: f32[2,39], index: 1, kind: input, shape index: {}]   ;;  %s2231_s2 = inlined_call_operand.hbm [shape: f32[9,32,32], index: 2, kind: input, shape index: {}]   ;;  %s2232_s3 = inlined_call_operand.vmem [shape: f32[27,32], index: 3, kind: input, shape index: {}]   ;;  %s2233_s4 = inlined_call_operand.vmem [shape: f32[136,8], index: 4, kind: input, shape index: {}]   ;;  %s2234_s5 = inlined_call_operand.vmem [shape: f32[34,32], index: 5, kind: input, shape index: {}]   ;;  %s2235_s6 = inlined_call_operand.hbm [shape: f32[2,8], index: 6, kind: output, shape index: {}]  }
   0x1   :  { %12 = vsyncpa [#allocation4], 0  ;;  %s1905_s21 = smov [#allocation2]   ;;  %s1857_s25 = scalar_lea.hbm %s2231_s2, 4608 }
   0x2   :  { %s22_s22 = sshll.u32 %s1905_s21, 4  ;;  %p1858_p0 = scmp.ne.s32.totalorder %s2231_s2, %s1857_s25  ;;  %s23_s22 = int_to_ptr.vmem [resolvable:$true] %s22_s22 }
   0x3   :  { %p1861_p1 = scmp.lt.u32.totalorder %s1857_s25, %s2231_s2 }
   0x5   :  { %p1863_p2 = pnand %p1861_p1, %p1858_p0 }
   0x7   :  { %1866 = shalt.err (!%p1863_p2)
}
   0x8   :  { %s1867_s30 = scalar_lea.vmem %s23_s22, 4608  ;;  %p1872_p4 = scmp.lt.s32.totalorder %s23_s22, %s23_s22 }
   0x9   :  { %p1868_p3 = scmp.ne.s32.totalorder %s23_s22, %s1867_s30  ;;  %p1873_p5 = scmp.lt.s32.totalorder %s1867_s30, %s1867_s30 }
   0xb   :  { %p1874_p6 = por %p1873_p5, %p1872_p4 }
   0xd   :  { %p1875_p7 = pnand %p1874_p6, %p1868_p3 }
   0xf   :  { %1878 = shalt.err (!%p1875_p7)
}
  0x10   :  { %s1906_s7 = smov 128   ;;  %s1907_s8 = smov 8  }
  0x11   :  { %28 = dma.hbm_to_vmem [thread:$0]  %s2231_s2, 4608, %s23_s22, [#allocation3], %s1906_s7, %s1906_s7, %s1907_s8  }
  0x12   :  { %1901 = dma.done.wait [#allocation3], 4608  }
  0x13   :  { %1902 = vsyncadd [#allocation3], 4294962688  ;;  %v1908_v0 = vmov 0   ;;  %v44_v1 = vld [vmem:[%s2229_s0] sm:$0xff]  ;;  %v45_v2 = vld [vmem:[%s2229_s0 + $0x8] sm:$0xff]  ;;  %v159_v11 = vlaneseq  ;;  %vm186_vm2 = vcmask 261120  }
  0x14   :  { %1856 = vset.pattern.permute.xlu0 %v1908_v0  ;;  %v177_v3 = vld [vmem:[#allocation2] sm:$0xff]  ;;  %v178_v4 = vld [vmem:[#allocation2 + $0x8] sm:$0xff]  ;;  %v179_v6 = vld [vmem:[#allocation2 + $0x10] sm:$0xff]  ;;  %vm83_vm3 = vcmask 1046528   ;;  %vm79_vm4 = vcmask 318464   ;;  %vm1911_vm5 = vmmov 0  }
  0x15   :  { %48 = vperm.xlu0 %1856, %v44_v1   ;;  %v1751_v5 = vpack.c.bf16 %v178_v4, %v177_v3  ;;  %v180_v7 = vld [vmem:[#allocation2 + $0x18] sm:$0xff]  ;;  %v1472_v9 = vld [vmem:[%s2234_s5 + $0x20] ss:$0 sm:$0xff]  ;;  %v1473_v13 = vld [vmem:[%s2234_s5 + $0x21] ss:$0 sm:$0xff]  ;;  %v1972_v14 = vshrl.u32 %v159_v11, 7 }
  0x16   :  { %v1755_v8 = vpack.c.bf16 %v180_v7, %v179_v6  ;;  %v1979_v21 = vld [vmem:[%s2234_s5 + $0x8] sm:$0xff]  ;;  %v1984_v24 = vld [vmem:[%s2234_s5] sm:$0xff]  ;;  %v1991_v26 = vld [vmem:[%s2234_s5 + $0x10] sm:$0xff]  ;;  %vm518_vm6 = vcmask 1041409   ;;  %s1912_s7 = smov [#allocation5]   ;;  %vm1455_vm7 = vcmask 58368  }
  0x17   :  { %1752 = vmatprep.subr.bf16.mxu1 %v1751_v5  ;;  %vm161_vm0 = vcmp.lt.s32.totalorder %v1972_v14, 1  ;;  %vm166_vm1 = vcmp.lt.s32.totalorder %v1972_v14, 7  ;;  %v2000_v29 = vld [vmem:[%s2234_s5 + $0x18] sm:$0xff]  ;;  %v285_v39 = vld [vmem:[#allocation2 + $0x20] sm:$0xff]  ;;  %v286_v40 = vld [vmem:[#allocation2 + $0x28] sm:$0xff]  ;;  %s1463_s8 = sshll.u32 %s1912_s7, 4  ;;  %s1464_s8 = int_to_ptr.vmem [resolvable:$true] %s1463_s8 }
  0x18   :  { %1754 = vmatpush3.bf16.msra.mxu1 %v1751_v5  ;;  %v1759_v41 = vpack.c.bf16 %v286_v40, %v285_v39  ;;  %v287_v42 = vld [vmem:[#allocation2 + $0x30] sm:$0xff]  ;;  %v288_v43 = vld [vmem:[#allocation2 + $0x38] sm:$0xff]  ;;  %v1477_v45 = vld [vmem:[%s2232_s3] ss:$0 sm:$0xff]  ;;  %s1879_s9 = scalar_lea.vmem %s1464_s8, 32  ;;  %p1884_p9 = scmp.lt.s32.totalorder %s1464_s8, %s1464_s8 }
  0x19   :  { %53 = vperm.xlu0 %1856, %v45_v2   ;;  %1756 = vmatprep.subr.bf16.mxu1 %v1755_v8  ;;  %v1763_v44 = vpack.c.bf16 %v288_v43, %v287_v42  ;;  %v1480_v49 = vld [vmem:[%s2232_s3 + $0x9] ss:$0 sm:$0xff]  ;;  %v1481_v54 = vld [vmem:[%s2232_s3 + $0x12] ss:$0 sm:$0xff]  ;;  %v392_v58 = vld [vmem:[#allocation2 + $0x40] sm:$0xff]  ;;  %p1880_p8 = scmp.ne.s32.totalorder %s1464_s8, %s1879_s9  ;;  %p1885_p10 = scmp.lt.s32.totalorder %s1879_s9, %s1879_s9 }
  0x1a   :  { %v393_v59 = vld [vmem:[#allocation2 + $0x48] sm:$0xff]  ;;  %v394_v61 = vld [vmem:[#allocation2 + $0x50] sm:$0xff]  ;;  %v395_v62 = vld [vmem:[#allocation2 + $0x58] sm:$0xff] }
  0x1b   :  { %v1767_v60 = vpack.c.bf16 %v393_v59, %v392_v58  ;;  %v1771_v63 = vpack.c.bf16 %v395_v62, %v394_v61  ;;  %v1482_v0 = vld [vmem:[%s2232_s3 + $0x1] ss:$0 sm:$0xff]  ;;  %v1485_v4 = vld [vmem:[%s2232_s3 + $0xa] ss:$0 sm:$0xff]  ;;  %v1487_v40 = vld [vmem:[%s2232_s3 + $0x2] ss:$0 sm:$0xff]  ;;  %p1886_p11 = por %p1885_p10, %p1884_p9 }
  0x1c   :  { %1758 = vmatpush3.bf16.msra.mxu1 %v1755_v8 }
  0x1d   :  { %1760 = vmatprep.subr.bf16.mxu1 %v1759_v41  ;;  %p1887_p12 = pnand %p1886_p11, %p1880_p8 }
  0x94   :  { %v49_v10 = vpop.permute.xlu0 %48 }
  0x95   :  { %v60_v12 = vmul.f32 %v1472_v9, %v49_v10 }
  0x97   :  { %v66_v16 = vadd.f32 %v1473_v13, %v60_v12 }
  0x98   :  { %v54_v15 = vpop.permute.xlu0 %53 }
  0x99   :  { %v61_v17 = vmul.f32 %v1472_v9, %v54_v15  ;;  %v157_v19 = vrot.slane %v66_v16, 7  ;;  %v164_v20 = vrot.slane %v66_v16, 1  ;;  %v1486_v9 = vld [vmem:[%s2232_s3 + $0x13] ss:$0 sm:$0xff]  ;;  %v70_v15 = vld [vmem:[%s2233_s4 + $0x68] sm:$0xff] }
  0x9b   :  { %v67_v18 = vadd.f32 %v1473_v13, %v61_v17  ;;  %v69_v13 = vld [vmem:[%s2233_s4 + $0x60] sm:$0xff]  ;;  %v1909_v17 = vmov 0.0|0.0  }
  0x9c   :  { %1745 = vmatprep.subr.bf16.mxu0 %v1909_v17 }
  0x9d   :  { %v158_v22 = vrot.slane %v67_v18, 7  ;;  %v165_v23 = vrot.slane %v67_v18, 1 }
  0x9f   :  { %v162_v25 = vsel %vm161_vm0, %v157_v19, %v158_v22  ;;  %v163_v27 = vsel %vm161_vm0, %v158_v22, %v157_v19  ;;  %v167_v28 = vsel %vm166_vm1, %v164_v20, %v165_v23  ;;  %v168_v30 = vsel %vm166_vm1, %v165_v23, %v164_v20  ;;  %v72_v19 = vld [vmem:[%s2233_s4 + $0x78] sm:$0xff]  ;;  %v610_v22 = vld [vmem:[#allocation2 + $0x60] sm:$0xff]  ;;  %v611_v23 = vld [vmem:[#allocation2 + $0x68] sm:$0xff] }
  0xa0   :  { %v170_v31 = vmul.f32 %v162_v25, %v1979_v21  ;;  %v169_v32 = vmul.f32 %v163_v27, %v1984_v24  ;;  %v173_v35 = vmul.f32 %v167_v28, %v1991_v26  ;;  %v174_v36 = vmul.f32 %v168_v30, %v2000_v29  ;;  %v73_v27 = vld [vmem:[%s2233_s4 + $0x80] sm:$0x7f] }
  0xa1   :  { %v1781_v25 = vpack.c.bf16 %v611_v23, %v610_v22  ;;  %v1910_v28 = vmov 0.0   ;;  %v68_v30 = vld [vmem:[%s2230_s1] sm:$0x3] }
  0xa2   :  { %v172_v33 = vadd.f32 %v170_v31, %v67_v18  ;;  %v171_v34 = vadd.f32 %v169_v32, %v66_v16  ;;  %v1746_v16 = vpack.c.bf16 %v70_v15, %v69_v13  ;;  %v71_v18 = vld [vmem:[%s2233_s4 + $0x70] sm:$0xff]  ;;  %1610 = vmatprep.mubr.msk.f32.mxu0 %vm1911_vm5, %v1910_v28  ;;  %v613_v32 = vld [vmem:[#allocation2 + $0x78] sm:$0xff]  ;;  %v717_v23 = vld [vmem:[#allocation2 + $0x80] sm:$0xff] }
  0xa3   :  { %v1749_v20 = vpack.c.bf16 %v72_v19, %v71_v18  ;;  %v612_v31 = vld [vmem:[#allocation2 + $0x70] sm:$0xff] }
  0xa4   :  { %v175_v37 = vadd.f32 %v173_v35, %v171_v34  ;;  %v176_v38 = vadd.f32 %v174_v36, %v172_v33  ;;  %1747 = vmatpush3.bf16.msra.mxu0 %v1746_v16  ;;  %v1785_v33 = vpack.c.bf16 %v613_v32, %v612_v31  ;;  %v512_v34 = vld [vmem:[%s2233_s4] sm:$0xff]  ;;  %v513_v35 = vld [vmem:[%s2233_s4 + $0x8] sm:$0xff]  ;;  %v720_v31 = vld [vmem:[#allocation2 + $0x98] sm:$0xff] }
  0xa5   :  { %1748 = vmatprep.subr.bf16.mxu0 %v1909_v17  ;;  %v1776_v36 = vpack.c.bf16 %v513_v35, %v512_v34 }
  0xa6   :  { %1621 = vmatprep.mubr.msk.f32.mxu1 %vm186_vm2, %v175_v37  ;;  %v514_v37 = vld [vmem:[%s2233_s4 + $0x10] sm:$0xff] }
  0xa7   :  { %1622 = vmatmul.mubr.msk.f32.vlgmr.msra.gmra.mrb[0].mxu1 %vm186_vm2, %v176_v38  ;;  %v515_v38 = vld [vmem:[%s2233_s4 + $0x18] sm:$0xff] }
  0xa8   :  { %1762 = vmatpush3.bf16.msra.mxu1 %v1759_v41  ;;  %1750 = vmatpush3.bf16.msra.mxu0 %v1749_v20  ;;  %v1779_v39 = vpack.c.bf16 %v515_v38, %v514_v37  ;;  %v1496_v37 = vld [vmem:[%s2232_s3 + $0xc] ss:$0 sm:$0xff] }
  0xa9   :  { %1764 = vmatprep.subr.bf16.mxu1 %v1763_v44  ;;  %1608 = vmatprep.subr.mxu0 %v1910_v28 }
  0xac   :  { %1766 = vmatpush3.bf16.msra.mxu1 %v1763_v44  ;;  %1609 = vmatpush3.msk.msra.mxu0 %vm83_vm3, %v73_v27  ;;  %v1490_v44 = vld [vmem:[%s2232_s3 + $0xb] ss:$0 sm:$0xff] }
  0xad   :  { %1768 = vmatprep.subr.bf16.mxu1 %v1767_v60  ;;  %1611 = vmatmul.mubr.msk.f32.vlgmr.msra.gmra.mrb[0].mxu0 %vm79_vm4, %v68_v30  ;;  %v719_v30 = vld [vmem:[#allocation2 + $0x90] sm:$0xff] }
  0xae   :  { %1775 = vmatprep.subr.bf16.mxu0 %v1909_v17  ;;  %1654 = vmatprep.mubr.msk.f32.mxu0 %vm1911_vm5, %v1910_v28  ;;  %v1793_v32 = vpack.c.bf16 %v720_v31, %v719_v30 }
  0xaf   :  { %1777 = vmatpush3.bf16.msra.mxu0 %v1776_v36 }
  0xb0   :  { %1778 = vmatprep.subr.bf16.mxu0 %v1909_v17 }
  0xb3   :  { %1780 = vmatpush3.bf16.msra.mxu0 %v1779_v39 }
 0x17a   :  { %v1623_v46 = vpop.f32.mrb[0].mxu1 }
 0x17b   :  { %v265_v47 = vadd.f32 %v1623_v46, %v1477_v45  ;;  %v259_v48 = vpop.f32.mrb[1].mxu1 }
 0x17c   :  { %v260_v50 = vadd.f32 %v1477_v45, %v259_v48 }
 0x17d   :  { %v269_v51 = vmax.f32 %v265_v47, 0.0  ;;  %v1491_v47 = vld [vmem:[%s2232_s3 + $0x14] ss:$0 sm:$0xff] }
 0x17e   :  { %v268_v52 = vmax.f32 %v260_v50, 0.0 }
 0x17f   :  { %v276_v53 = vmul.f32 %v1480_v49, %v269_v51 }
 0x180   :  { %v275_v55 = vmul.f32 %v1480_v49, %v268_v52 }
 0x181   :  { %v283_v57 = vadd.f32 %v1481_v54, %v276_v53 }
 0x182   :  { %v282_v56 = vadd.f32 %v1481_v54, %v275_v55 }
 0x184   :  { %1632 = vmatprep.mubr.msk.f32.mxu1 %vm186_vm2, %v282_v56 }
 0x185   :  { %1633 = vmatmul.mubr.msk.f32.vlgmr.msra.gmra.mrb[2].mxu1 %vm186_vm2, %v283_v57 }
 0x186   :  { %1770 = vmatpush3.bf16.msra.mxu1 %v1767_v60 }
 0x187   :  { %1772 = vmatprep.subr.bf16.mxu1 %v1771_v63 }
 0x18a   :  { %1774 = vmatpush3.bf16.msra.mxu1 %v1771_v63 }
 0x18b   :  { %1782 = vmatprep.subr.bf16.mxu1 %v1781_v25 }
 0x258   :  { %v1634_v1 = vpop.f32.mrb[2].mxu1 }
 0x259   :  { %v372_v2 = vadd.f32 %v1634_v1, %v1482_v0  ;;  %v366_v3 = vpop.f32.mrb[3].mxu1 }
 0x25a   :  { %v367_v5 = vadd.f32 %v1482_v0, %v366_v3 }
 0x25b   :  { %v376_v6 = vmax.f32 %v372_v2, 0.0 }
 0x25c   :  { %v375_v7 = vmax.f32 %v367_v5, 0.0 }
 0x25d   :  { %v383_v8 = vmul.f32 %v1485_v4, %v376_v6 }
 0x25e   :  { %v382_v10 = vmul.f32 %v1485_v4, %v375_v7 }
 0x25f   :  { %v390_v12 = vadd.f32 %v1486_v9, %v383_v8 }
 0x260   :  { %v389_v11 = vadd.f32 %v1486_v9, %v382_v10 }
 0x262   :  { %1643 = vmatprep.mubr.msk.f32.mxu1 %vm186_vm2, %v389_v11 }
 0x263   :  { %1644 = vmatmul.mubr.msk.f32.vlgmr.msra.gmra.mrb[4].mxu1 %vm186_vm2, %v390_v12 }
 0x264   :  { %1784 = vmatpush3.bf16.msra.mxu1 %v1781_v25  ;;  %v718_v25 = vld [vmem:[#allocation2 + $0x88] sm:$0xff] }
 0x265   :  { %1786 = vmatprep.subr.bf16.mxu1 %v1785_v33  ;;  %v1789_v27 = vpack.c.bf16 %v718_v25, %v717_v23  ;;  %v1507_v23 = vld [vmem:[%s2232_s3 + $0x17] ss:$0 sm:$0xff] }
 0x268   :  { %1788 = vmatpush3.bf16.msra.mxu1 %v1785_v33  ;;  %v1493_v33 = vld [vmem:[%s2232_s3 + $0x3] ss:$0 sm:$0xff] }
 0x269   :  { %1790 = vmatprep.subr.bf16.mxu1 %v1789_v27 }
 0x336   :  { %v1645_v41 = vpop.f32.mrb[4].mxu1 }
 0x337   :  { %v479_v42 = vadd.f32 %v1645_v41, %v1487_v40  ;;  %v473_v43 = vpop.f32.mrb[5].mxu1 }
 0x338   :  { %v474_v45 = vadd.f32 %v1487_v40, %v473_v43 }
 0x339   :  { %v483_v46 = vmax.f32 %v479_v42, 0.0  ;;  %v1497_v42 = vld [vmem:[%s2232_s3 + $0x15] ss:$0 sm:$0xff] }
 0x33a   :  { %v482_v48 = vmax.f32 %v474_v45, 0.0 }
 0x33b   :  { %v490_v49 = vmul.f32 %v1490_v44, %v483_v46  ;;  %v824_v46 = vld [vmem:[#allocation2 + $0xa0] sm:$0xff] }
 0x33c   :  { %v489_v50 = vmul.f32 %v1490_v44, %v482_v48 }
 0x33d   :  { %v497_v51 = vadd.f32 %v1491_v47, %v490_v49  ;;  %v826_v49 = vld [vmem:[#allocation2 + $0xb0] sm:$0xff] }
 0x33e   :  { %v496_v52 = vadd.f32 %v1491_v47, %v489_v50  ;;  %v825_v47 = vld [vmem:[#allocation2 + $0xa8] sm:$0xff]  ;;  %v827_v50 = vld [vmem:[#allocation2 + $0xb8] sm:$0xff] }
 0x33f   :  { %v505_v53 = vsel %vm186_vm2, %v497_v51, 0.0  ;;  %v594_v54 = vrot.slane %v497_v51, 7  ;;  %v598_v55 = vrot.slane %v497_v51, 1  ;;  %v1797_v48 = vpack.c.bf16 %v825_v47, %v824_v46 }
 0x340   :  { %v506_v56 = vrot.slane %v505_v53, 4  ;;  %v498_v57 = vsel %vm186_vm2, %v496_v52, 0.0  ;;  %v593_v58 = vrot.slane %v496_v52, 7  ;;  %v597_v59 = vrot.slane %v496_v52, 1 }
 0x341   :  { %v499_v60 = vrot.slane %v498_v57, 4  ;;  %1798 = vmatprep.subr.bf16.mxu0 %v1797_v48 }
 0x342   :  { %v507_v61 = vadd.f32 %v506_v56, %v505_v53  ;;  %v596_v62 = vsel %vm161_vm0, %v594_v54, %v593_v58  ;;  %v599_v63 = vsel %vm166_vm1, %v597_v59, %v598_v55  ;;  %v595_v0 = vsel %vm161_vm0, %v593_v58, %v594_v54  ;;  %v1501_v56 = vld [vmem:[%s2232_s3 + $0xd] ss:$0 sm:$0xff] }
 0x343   :  { %v500_v1 = vadd.f32 %v499_v60, %v498_v57  ;;  %v601_v2 = vmul.f32 %v596_v62, %v1984_v24  ;;  %v600_v3 = vsel %vm166_vm1, %v598_v55, %v597_v59  ;;  %v602_v4 = vmul.f32 %v595_v0, %v1979_v21 }
 0x344   :  { %v508_v5 = vrot.slane %v507_v61, 2  ;;  %v605_v7 = vmul.f32 %v599_v63, %v1991_v26  ;;  %v606_v10 = vmul.f32 %v600_v3, %v2000_v29 }
 0x345   :  { %v603_v6 = vadd.f32 %v601_v2, %v496_v52  ;;  %v501_v8 = vrot.slane %v500_v1, 2  ;;  %v604_v9 = vadd.f32 %v602_v4, %v497_v51  ;;  %v1801_v51 = vpack.c.bf16 %v827_v50, %v826_v49  ;;  %v1498_v52 = vld [vmem:[%s2232_s3 + $0x4] ss:$0 sm:$0xff]  ;;  %v1042_v2 = vld [vmem:[#allocation2 + $0xc8] sm:$0xff]  ;;  %v1043_v4 = vld [vmem:[#allocation2 + $0xd0] sm:$0xff] }
 0x346   :  { %v509_v11 = vadd.f32 %v508_v5, %v507_v61  ;;  %v1502_v61 = vld [vmem:[%s2232_s3 + $0x16] ss:$0 sm:$0xff]  ;;  %v1044_v5 = vld [vmem:[#allocation2 + $0xd8] sm:$0xff] }
 0x347   :  { %v607_v12 = vadd.f32 %v605_v7, %v603_v6  ;;  %v502_v13 = vadd.f32 %v501_v8, %v500_v1  ;;  %v608_v15 = vadd.f32 %v606_v10, %v604_v9  ;;  %v1041_v1 = vld [vmem:[#allocation2 + $0xc0] sm:$0xff]  ;;  %v1815_v7 = vpack.c.bf16 %v1044_v5, %v1043_v4  ;;  %v945_v8 = vld [vmem:[%s2233_s4 + $0x28] sm:$0xff]  ;;  %v946_v10 = vld [vmem:[%s2233_s4 + $0x30] sm:$0xff] }
 0x348   :  { %v510_v16 = vrot.slane %v509_v11, 1  ;;  %v1811_v3 = vpack.c.bf16 %v1042_v2, %v1041_v1  ;;  %v944_v6 = vld [vmem:[%s2233_s4 + $0x20] sm:$0xff]  ;;  %v1512_v5 = vld [vmem:[%s2232_s3 + $0xf] ss:$0 sm:$0xff] }
 0x349   :  { %1665 = vmatprep.mubr.msk.f32.mxu1 %vm186_vm2, %v607_v12  ;;  %v503_v18 = vrot.slane %v502_v13, 1  ;;  %v1806_v9 = vpack.c.bf16 %v945_v8, %v944_v6  ;;  %v1509_v1 = vld [vmem:[%s2232_s3 + $0x6] ss:$0 sm:$0xff] }
 0x34a   :  { %1666 = vmatmul.mubr.msk.f32.vlgmr.msra.gmra.mrb[6].mxu1 %vm186_vm2, %v608_v15  ;;  %v511_v19 = vadd.f32 %v510_v16, %v509_v11  ;;  %v947_v11 = vld [vmem:[%s2233_s4 + $0x38] sm:$0xff] }
 0x34b   :  { %v504_v20 = vadd.f32 %v503_v18, %v502_v13  ;;  %1792 = vmatpush3.bf16.msra.mxu1 %v1789_v27  ;;  %v1809_v12 = vpack.c.bf16 %v947_v11, %v946_v10  ;;  %v1503_v13 = vld [vmem:[%s2232_s3 + $0x5] ss:$0 sm:$0xff]  ;;  %v1513_v10 = vld [vmem:[%s2232_s3 + $0x18] ss:$0 sm:$0xff] }
 0x34c   :  { %1794 = vmatprep.subr.bf16.mxu1 %v1793_v32 }
 0x34d   :  { %v519_v22 = vsel %vm518_vm6, %v511_v19, %v504_v20  ;;  %v1506_v19 = vld [vmem:[%s2232_s3 + $0xe] ss:$0 sm:$0xff] }
 0x34e   :  { %1655 = vmatmul.mubr.msk.f32.vlgmr.msra.gmra.mrb[0].mxu0 %vm186_vm2, %v519_v22 }
 0x34f   :  { %1796 = vmatpush3.bf16.msra.mxu1 %v1793_v32  ;;  %1800 = vmatpush3.bf16.msra.mxu0 %v1797_v48 }
 0x350   :  { %1802 = vmatprep.subr.bf16.mxu0 %v1801_v51  ;;  %1812 = vmatprep.subr.bf16.mxu1 %v1811_v3 }
 0x353   :  { %1804 = vmatpush3.bf16.msra.mxu0 %v1801_v51 }
 0x354   :  { %1805 = vmatprep.subr.bf16.mxu0 %v1909_v17 }
 0x41d   :  { %v1667_v34 = vpop.f32.mrb[6].mxu1 }
 0x41e   :  { %v697_v35 = vadd.f32 %v1667_v34, %v1493_v33  ;;  %v691_v36 = vpop.f32.mrb[7].mxu1 }
 0x41f   :  { %v692_v38 = vadd.f32 %v1493_v33, %v691_v36 }
 0x420   :  { %v701_v39 = vmax.f32 %v697_v35, 0.0 }
 0x421   :  { %v700_v40 = vmax.f32 %v692_v38, 0.0 }
 0x422   :  { %v708_v41 = vmul.f32 %v1496_v37, %v701_v39 }
 0x423   :  { %v707_v43 = vmul.f32 %v1496_v37, %v700_v40 }
 0x424   :  { %v715_v45 = vadd.f32 %v1497_v42, %v708_v41 }
 0x425   :  { %v714_v44 = vadd.f32 %v1497_v42, %v707_v43 }
 0x427   :  { %1676 = vmatprep.mubr.msk.f32.mxu1 %vm186_vm2, %v714_v44 }
 0x428   :  { %1677 = vmatmul.mubr.msk.f32.vlgmr.msra.gmra.mrb[8].mxu1 %vm186_vm2, %v715_v45 }
 0x429   :  { %1814 = vmatpush3.bf16.msra.mxu1 %v1811_v3 }
 0x42a   :  { %1816 = vmatprep.subr.bf16.mxu1 %v1815_v7 }
 0x42d   :  { %1818 = vmatpush3.bf16.msra.mxu1 %v1815_v7 }
 0x4fb   :  { %v1678_v53 = vpop.f32.mrb[8].mxu1 }
 0x4fc   :  { %v804_v54 = vadd.f32 %v1678_v53, %v1498_v52  ;;  %v798_v55 = vpop.f32.mrb[9].mxu1 }
 0x4fd   :  { %v799_v57 = vadd.f32 %v1498_v52, %v798_v55 }
 0x4fe   :  { %v808_v58 = vmax.f32 %v804_v54, 0.0 }
 0x4ff   :  { %v807_v59 = vmax.f32 %v799_v57, 0.0 }
 0x500   :  { %v815_v60 = vmul.f32 %v1501_v56, %v808_v58 }
 0x501   :  { %v814_v62 = vmul.f32 %v1501_v56, %v807_v59 }
 0x502   :  { %v822_v0 = vadd.f32 %v1502_v61, %v815_v60 }
 0x503   :  { %v821_v63 = vadd.f32 %v1502_v61, %v814_v62  ;;  %v1149_v61 = vld [vmem:[#allocation2 + $0xe8] sm:$0xff] }
 0x505   :  { %1687 = vmatprep.mubr.msk.f32.mxu0 %vm186_vm2, %v821_v63  ;;  %v1151_v63 = vld [vmem:[#allocation2 + $0xf8] sm:$0xff] }
 0x506   :  { %1688 = vmatmul.mubr.msk.f32.vlgmr.msra.gmra.mrb[2].mxu0 %vm186_vm2, %v822_v0 }
 0x507   :  { %1698 = vmatprep.mubr.msk.f32.mxu0 %vm1911_vm5, %v1910_v28  ;;  %1807 = vmatpush3.bf16.msra.mxu0 %v1806_v9 }
 0x508   :  { %1808 = vmatprep.subr.bf16.mxu0 %v1909_v17 }
 0x50b   :  { %1810 = vmatpush3.bf16.msra.mxu0 %v1809_v12 }
 0x5d9   :  { %v1689_v15 = vpop.f32.mrb[2].mxu0 }
 0x5da   :  { %v911_v16 = vadd.f32 %v1689_v15, %v1503_v13  ;;  %v905_v18 = vpop.f32.mrb[3].mxu0  ;;  %v1255_v15 = vld [vmem:[#allocation2 + $0x100] sm:$0xff] }
 0x5db   :  { %v906_v20 = vadd.f32 %v1503_v13, %v905_v18 }
 0x5dc   :  { %v915_v22 = vmax.f32 %v911_v16, 0.0  ;;  %v1256_v16 = vld [vmem:[#allocation2 + $0x108] sm:$0xff] }
 0x5dd   :  { %v914_v25 = vmax.f32 %v906_v20, 0.0  ;;  %v1827_v18 = vpack.c.bf16 %v1256_v16, %v1255_v15  ;;  %v1258_v20 = vld [vmem:[#allocation2 + $0x118] sm:$0xff] }
 0x5de   :  { %v922_v27 = vmul.f32 %v1506_v19, %v915_v22 }
 0x5df   :  { %v921_v30 = vmul.f32 %v1506_v19, %v914_v25  ;;  %1828 = vmatprep.subr.bf16.mxu0 %v1827_v18  ;;  %v1257_v19 = vld [vmem:[#allocation2 + $0x110] sm:$0xff] }
 0x5e0   :  { %v929_v31 = vadd.f32 %v1507_v23, %v922_v27  ;;  %v1831_v22 = vpack.c.bf16 %v1258_v20, %v1257_v19 }
 0x5e1   :  { %v928_v32 = vadd.f32 %v1507_v23, %v921_v30  ;;  %v1514_v23 = vld [vmem:[%s2232_s3 + $0x7] ss:$0 sm:$0xff] }
 0x5e2   :  { %v937_v33 = vsel %vm186_vm2, %v929_v31, 0.0  ;;  %v1025_v34 = vrot.slane %v929_v31, 7  ;;  %v1029_v35 = vrot.slane %v929_v31, 1 }
 0x5e3   :  { %v938_v36 = vrot.slane %v937_v33, 4  ;;  %v930_v37 = vsel %vm186_vm2, %v928_v32, 0.0  ;;  %v1024_v38 = vrot.slane %v928_v32, 7  ;;  %v1028_v39 = vrot.slane %v928_v32, 1 }
 0x5e4   :  { %v931_v40 = vrot.slane %v930_v37, 4 }
 0x5e5   :  { %v939_v41 = vadd.f32 %v938_v36, %v937_v33  ;;  %v1027_v42 = vsel %vm161_vm0, %v1025_v34, %v1024_v38  ;;  %v1030_v43 = vsel %vm166_vm1, %v1028_v39, %v1029_v35  ;;  %v1026_v44 = vsel %vm161_vm0, %v1024_v38, %v1025_v34  ;;  %v1518_v36 = vld [vmem:[%s2232_s3 + $0x19] ss:$0 sm:$0xff] }
 0x5e6   :  { %v932_v45 = vadd.f32 %v931_v40, %v930_v37  ;;  %v1032_v46 = vmul.f32 %v1027_v42, %v1984_v24  ;;  %v1031_v47 = vsel %vm166_vm1, %v1029_v35, %v1028_v39  ;;  %v1033_v48 = vmul.f32 %v1026_v44, %v1979_v21  ;;  %v1375_v40 = vld [vmem:[%s2233_s4 + $0x40] sm:$0xff] }
 0x5e7   :  { %v940_v49 = vrot.slane %v939_v41, 2  ;;  %v1036_v51 = vmul.f32 %v1030_v43, %v1991_v26  ;;  %v1037_v54 = vmul.f32 %v1031_v47, %v2000_v29  ;;  %v1148_v26 = vld [vmem:[#allocation2 + $0xe0] sm:$0xff]  ;;  %v1150_v29 = vld [vmem:[#allocation2 + $0xf0] sm:$0xff] }
 0x5e8   :  { %v1034_v50 = vadd.f32 %v1032_v46, %v928_v32  ;;  %v933_v52 = vrot.slane %v932_v45, 2  ;;  %v1035_v53 = vadd.f32 %v1033_v48, %v929_v31  ;;  %v1819_v62 = vpack.c.bf16 %v1149_v61, %v1148_v26  ;;  %v1517_v31 = vld [vmem:[%s2232_s3 + $0x10] ss:$0 sm:$0xff] }
 0x5e9   :  { %v941_v55 = vadd.f32 %v940_v49, %v939_v41  ;;  %v1823_v0 = vpack.c.bf16 %v1151_v63, %v1150_v29  ;;  %v1376_v41 = vld [vmem:[%s2233_s4 + $0x48] sm:$0xff]  ;;  %v1377_v43 = vld [vmem:[%s2233_s4 + $0x50] sm:$0xff] }
 0x5ea   :  { %v1038_v56 = vadd.f32 %v1036_v51, %v1034_v50  ;;  %v934_v57 = vadd.f32 %v933_v52, %v932_v45  ;;  %v1039_v58 = vadd.f32 %v1037_v54, %v1035_v53  ;;  %1820 = vmatprep.subr.bf16.mxu1 %v1819_v62  ;;  %v1836_v42 = vpack.c.bf16 %v1376_v41, %v1375_v40  ;;  %v1519_v45 = vld [vmem:[%s2232_s3 + $0x8] ss:$0 sm:$0xff]  ;;  %v1523_v51 = vld [vmem:[%s2232_s3 + $0x1a] ss:$0 sm:$0xff] }
 0x5eb   :  { %v942_v59 = vrot.slane %v941_v55, 1 }
 0x5ec   :  { %1709 = vmatprep.mubr.msk.f32.mxu1 %vm186_vm2, %v1038_v56  ;;  %v935_v24 = vrot.slane %v934_v57, 1 }
 0x5ed   :  { %1710 = vmatmul.mubr.msk.f32.vlgmr.msra.gmra.mrb[10].mxu1 %vm186_vm2, %v1039_v58  ;;  %v943_v14 = vadd.f32 %v942_v59, %v941_v55 }
 0x5ee   :  { %v936_v21 = vadd.f32 %v935_v24, %v934_v57  ;;  %1822 = vmatpush3.bf16.msra.mxu1 %v1819_v62 }
 0x5ef   :  { %1824 = vmatprep.subr.bf16.mxu1 %v1823_v0 }
 0x5f0   :  { %v950_v60 = vsel %vm518_vm6, %v943_v14, %v936_v21 }
 0x5f1   :  { %1699 = vmatmul.mubr.msk.f32.vlgmr.msra.gmra.mrb[0].mxu0 %vm186_vm2, %v950_v60 }
 0x5f2   :  { %1826 = vmatpush3.bf16.msra.mxu1 %v1823_v0  ;;  %1830 = vmatpush3.bf16.msra.mxu0 %v1827_v18 }
 0x5f3   :  { %1832 = vmatprep.subr.bf16.mxu0 %v1831_v22 }
 0x5f6   :  { %1834 = vmatpush3.bf16.msra.mxu0 %v1831_v22 }
 0x5f7   :  { %1835 = vmatprep.subr.bf16.mxu0 %v1909_v17 }
 0x6c0   :  { %v1711_v2 = vpop.f32.mrb[10].mxu1 }
 0x6c1   :  { %v1128_v3 = vadd.f32 %v1711_v2, %v1509_v1  ;;  %v1122_v4 = vpop.f32.mrb[11].mxu1 }
 0x6c2   :  { %v1123_v6 = vadd.f32 %v1509_v1, %v1122_v4 }
 0x6c3   :  { %v1132_v7 = vmax.f32 %v1128_v3, 0.0  ;;  %v1474_v3 = vld [vmem:[%s2233_s4 + $0x87] ss:$0 sm:$0xff] }
 0x6c4   :  { %v1131_v8 = vmax.f32 %v1123_v6, 0.0 }
 0x6c5   :  { %v1139_v9 = vmul.f32 %v1512_v5, %v1132_v7 }
 0x6c6   :  { %v1138_v11 = vmul.f32 %v1512_v5, %v1131_v8 }
 0x6c7   :  { %v1146_v13 = vadd.f32 %v1513_v10, %v1139_v9 }
 0x6c8   :  { %v1145_v12 = vadd.f32 %v1513_v10, %v1138_v11 }
 0x6ca   :  { %1720 = vmatprep.mubr.msk.f32.mxu1 %vm186_vm2, %v1145_v12 }
 0x6cb   :  { %1721 = vmatmul.mubr.msk.f32.vlgmr.msra.gmra.mrb[12].mxu1 %vm186_vm2, %v1146_v13 }
 0x79e   :  { %v1722_v25 = vpop.f32.mrb[12].mxu1 }
 0x79f   :  { %v1235_v27 = vadd.f32 %v1722_v25, %v1514_v23  ;;  %v1229_v30 = vpop.f32.mrb[13].mxu1 }
 0x7a0   :  { %v1230_v32 = vadd.f32 %v1514_v23, %v1229_v30 }
 0x7a1   :  { %v1239_v33 = vmax.f32 %v1235_v27, 0.0 }
 0x7a2   :  { %v1238_v34 = vmax.f32 %v1230_v32, 0.0 }
 0x7a3   :  { %v1246_v35 = vmul.f32 %v1517_v31, %v1239_v33 }
 0x7a4   :  { %v1245_v37 = vmul.f32 %v1517_v31, %v1238_v34 }
 0x7a5   :  { %v1253_v39 = vadd.f32 %v1518_v36, %v1246_v35 }
 0x7a6   :  { %v1252_v38 = vadd.f32 %v1518_v36, %v1245_v37 }
 0x7a8   :  { %1731 = vmatprep.mubr.msk.f32.mxu0 %vm186_vm2, %v1252_v38 }
 0x7a9   :  { %1732 = vmatmul.mubr.msk.f32.vlgmr.msra.gmra.mrb[4].mxu0 %vm186_vm2, %v1253_v39 }
 0x7aa   :  { %1742 = vmatprep.mubr.msk.f32.mxu0 %vm1911_vm5, %v1910_v28  ;;  %1837 = vmatpush3.bf16.msra.mxu0 %v1836_v42  ;;  %v1378_v28 = vld [vmem:[%s2233_s4 + $0x58] sm:$0xff] }
 0x7ab   :  { %1838 = vmatprep.subr.bf16.mxu0 %v1909_v17  ;;  %v1839_v44 = vpack.c.bf16 %v1378_v28, %v1377_v43  ;;  %v1522_v17 = vld [vmem:[%s2232_s3 + $0x11] ss:$0 sm:$0xff] }
 0x7ae   :  { %1840 = vmatpush3.bf16.msra.mxu0 %v1839_v44 }
 0x87c   :  { %v1733_v46 = vpop.f32.mrb[4].mxu0 }
 0x87d   :  { %v1342_v47 = vadd.f32 %v1733_v46, %v1519_v45  ;;  %v1336_v48 = vpop.f32.mrb[5].mxu0 }
 0x87e   :  { %v1337_v49 = vadd.f32 %v1519_v45, %v1336_v48 }
 0x87f   :  { %v1346_v50 = vmax.f32 %v1342_v47, 0.0 }
 0x880   :  { %v1345_v52 = vmax.f32 %v1337_v49, 0.0 }
 0x881   :  { %v1353_v53 = vmul.f32 %v1522_v17, %v1346_v50 }
 0x882   :  { %v1352_v54 = vmul.f32 %v1522_v17, %v1345_v52 }
 0x883   :  { %v1360_v55 = vadd.f32 %v1523_v51, %v1353_v53 }
 0x884   :  { %v1359_v56 = vadd.f32 %v1523_v51, %v1352_v54 }
 0x885   :  { %v1368_v57 = vsel %vm186_vm2, %v1360_v55, 0.0 }
 0x886   :  { %v1369_v58 = vrot.slane %v1368_v57, 4  ;;  %v1361_v59 = vsel %vm186_vm2, %v1359_v56, 0.0 }
 0x887   :  { %v1362_v24 = vrot.slane %v1361_v59, 4 }
 0x888   :  { %v1370_v14 = vadd.f32 %v1369_v58, %v1368_v57 }
 0x889   :  { %v1363_v21 = vadd.f32 %v1362_v24, %v1361_v59 }
 0x88a   :  { %v1371_v60 = vrot.slane %v1370_v14, 2 }
 0x88b   :  { %v1364_v26 = vrot.slane %v1363_v21, 2 }
 0x88c   :  { %v1372_v61 = vadd.f32 %v1371_v60, %v1370_v14 }
 0x88d   :  { %v1365_v62 = vadd.f32 %v1364_v26, %v1363_v21 }
 0x88e   :  { %v1373_v29 = vrot.slane %v1372_v61, 1 }
 0x88f   :  { %v1366_v63 = vrot.slane %v1365_v62, 1 }
 0x890   :  { %v1374_v0 = vadd.f32 %v1373_v29, %v1372_v61 }
 0x891   :  { %v1367_v1 = vadd.f32 %v1366_v63, %v1365_v62 }
 0x893   :  { %v1381_v2 = vsel %vm518_vm6, %v1374_v0, %v1367_v1 }
 0x894   :  { %1743 = vmatmul.mubr.msk.f32.vlgmr.msra.gmra.mrb[0].mxu0 %vm186_vm2, %v1381_v2 }
 0x967   :  { %v1450_v4 = vpop.f32.mrb[0].mxu0 }
 0x968   :  { %v1841_v5 = vadd.f32 %v1474_v3, %v1450_v4  ;;  %v1744_v6 = vpop.f32.mrb[1].mxu0 }
 0x96a   :  { %1456 = vst.msk [vmem:[#allocation5] sm:$0x3] %vm1455_vm7, %v1841_v5 }
 0x96b   :  { %1890 = shalt.err (!%p1887_p12)
}
 0x96c   :  { %s1891_s12 = scalar_lea.hbm %s2235_s6, 32 }
 0x96d   :  { %p1892_p13 = scmp.ne.s32.totalorder %s2235_s6, %s1891_s12  ;;  %p1895_p0 = scmp.lt.u32.totalorder %s1891_s12, %s2235_s6 }
 0x96f   :  { %p1897_p1 = pnand %p1895_p0, %p1892_p13 }
 0x971   :  { %1900 = shalt.err (!%p1897_p1)
}
 0x972   :  { %1466 = dma.vmem_to_hbm [thread:$0]  %s1464_s8, 32, %s2235_s6, [#allocation4]  }
 0x973   :  { %1903 = dma.done.wait [#allocation4], 32  }
 0x974   :  { %1904 = vsyncadd [#allocation4], 4294967264 }
 0x975   :  { %1470 = vsyncpa [#allocation3], 1 }
 0x976   :  { %1471 = vsyncpa [#allocation4], 1 }

</bundles_post_ra>
